<compile_context>
chip_gen: v5e
topology: v5e:2x2
jax: 0.10.0
libtpu: 0.0.40
codegen_flags: <defaults>
</compile_context>

<pallas_src>
import functools

import jax
import jax.numpy as jnp
from jax.experimental import pallas as pl
from jax.experimental.pallas import tpu as pltpu


# ----------------------------------------------------------------------------
# Generation-aware VMEM budgets
# ----------------------------------------------------------------------------
def _vmem_budgets():
    """Returns (vmem_limit_bytes, per-step tile budget bytes) for this TPU."""
    try:
        kind = jax.devices()[0].device_kind.lower()
    except Exception:
        kind = ""
    if "v7" in kind:                         # 64 MiB physical VMEM per TensorCore
        return 48 << 20, 6 << 20
    if "v2" in kind or "v3" in kind:         # 16 MiB physical VMEM
        return 12 << 20, 2 << 20
    return 96 << 20, 12 << 20                # v4 / v5e / v5p / v6e: 128 MiB physical


def _round_up(x, m):
    return ((x + m - 1) // m) * m


def _block_bytes(shape, dtype):
    """VMEM footprint of a block/value: minor dim padded to 128 lanes,
    second-minor padded to the dtype's sublane tile (8 x 32-bit rows)."""
    itemsize = jnp.dtype(dtype).itemsize
    sublane = 8 * (4 // itemsize)            # 8 for f32, 16 for bf16
    dims = list(shape)
    dims[-1] = _round_up(dims[-1], 128)
    if len(dims) >= 2:
        dims[-2] = _round_up(dims[-2], sublane)
    n = itemsize
    for d in dims:
        n *= d
    return n


# ----------------------------------------------------------------------------
# Fused conv layer kernel
# ----------------------------------------------------------------------------
def _conv3x3_kernel(x_ref, w_ref, b_ref, o_ref, *,
                    H_in, W_in, TH, Cout, relu, pre_up, pool):
    """Fused [2x nearest up (opt) -> reflect-pad -> 3x3 conv -> bias -> ReLU
    (opt) -> 2x2 maxpool (opt)] on one output-row tile of one image.

    x_ref : (1, H_in, W_in, Cin)         whole image, revisited across row tiles
    w_ref : (9*Cin, Cout)                weights, (dy, dx, cin) flattened into K
    b_ref : (1, Cout)                    bias (f32)
    o_ref : (1, TH,    Wc,    Cout)      pool=False
            (1, TH//2, Wc//2, Cout)      pool=True
        where Wc = 2*W_in if pre_up else W_in (conv-resolution width)
    """
    Cin = x_ref.shape[-1]
    Wc = 2 * W_in if pre_up else W_in                 # conv-resolution width
    Hc = 2 * H_in if pre_up else H_in                 # conv-resolution height
    r0 = pl.program_id(1) * TH                        # first conv-output row

    # ---- halo gather (+ optional fused 2x nearest upsample of the input) ----
    # All assembly stays in the storage dtype (bf16 path stays bf16 end to
    # end); only the MXU accumulator below is f32.
    if pre_up:
        # Conv rows [r0-1 .. r0+TH] with reflection at the *upsampled*
        # resolution; upsampled row u maps to input row u // 2.
        top_in = jnp.where(r0 == 0, 0, r0 // 2 - 1)
        bot_in = jnp.where(r0 + TH == Hc, H_in - 1, r0 // 2 + TH // 2)
        top = x_ref[0, pl.ds(top_in, 1)]                         # (1,     W_in, Cin)
        mid = x_ref[0, pl.ds(r0 // 2, TH // 2)]                  # (TH//2, W_in, Cin)
        bot = x_ref[0, pl.ds(bot_in, 1)]                         # (1,     W_in, Cin)
        # 2x nearest upsample of the interior rows (halo rows are already
        # single rows in the upsampled space).
        mid = jnp.broadcast_to(mid[:, None], (TH // 2, 2, W_in, Cin))
        mid = mid.reshape(TH, W_in, Cin)
        xh = jnp.concatenate([top, mid, bot], axis=0)            # (TH+2, W_in, Cin)
        # 2x nearest upsample in W.  Reflection pad at the upsampled
        # resolution degenerates to duplicating the first / last upsampled
        # column (up col 1 == up col 0 == in col 0, etc.).
        xw = jnp.broadcast_to(xh[:, :, None], (TH + 2, W_in, 2, Cin))
        xw = xw.reshape(TH + 2, Wc, Cin)
        xp = jnp.concatenate([xw[:, :1], xw, xw[:, Wc - 1:Wc]], axis=1)
    else:
        top_r = jnp.where(r0 == 0, 1, r0 - 1)                    # row -1 -> row 1
        bot_r = jnp.where(r0 + TH == H_in, H_in - 2, r0 + TH)    # row  H -> row H-2
        top = x_ref[0, pl.ds(top_r, 1)]                          # (1,  W_in, Cin)
        mid = x_ref[0, pl.ds(r0, TH)]                            # (TH, W_in, Cin)
        bot = x_ref[0, pl.ds(bot_r, 1)]                          # (1,  W_in, Cin)
        xh = jnp.concatenate([top, mid, bot], axis=0)            # (TH+2, W_in, Cin)
        xp = jnp.concatenate([xh[:, 1:2], xh, xh[:, W_in - 2:W_in - 1]], axis=1)
    # xp: (TH+2, Wc+2, Cin)

    # ---- im2col: 3 dx shifts then 3 dy shifts; K order = (dy, dx, cin) ------
    xc = jnp.concatenate([xp[:, dx:dx + Wc] for dx in range(3)], axis=-1)   # (TH+2, Wc, 3*Cin)
    patch = jnp.concatenate([xc[dy:dy + TH] for dy in range(3)], axis=-1)   # (TH,   Wc, 9*Cin)
    patch = patch.reshape(TH * Wc, 9 * Cin)

    # ---- single MXU matmul over K = 9*Cin, f32 accumulation -----------------
    acc = jnp.dot(patch, w_ref[...], preferred_element_type=jnp.float32)    # (TH*Wc, Cout)
    acc = acc + b_ref[...]
    if relu:
        acc = jnp.maximum(acc, 0.0)

    # ---- fused epilogue ------------------------------------------------------
    if pool:            # 2x2 max pool, stride 2
        y = jnp.max(acc.reshape(TH // 2, 2, Wc // 2, 2, Cout), axis=(1, 3))
        o_ref[...] = y[None].astype(o_ref.dtype)
    else:
        o_ref[...] = acc.reshape(1, TH, Wc, Cout).astype(o_ref.dtype)


# ----------------------------------------------------------------------------
# Row-tile selection (lane-padding / dtype / double-buffer aware)
# ----------------------------------------------------------------------------
def _pick_row_tile(H_in, W_in, Cin, Cout, dtype, *, pre_up, pool,
                   vmem_limit, tile_budget):
    Hc = 2 * H_in if pre_up else H_in
    Wc = 2 * W_in if pre_up else W_in

    # TH-independent VMEM: the whole-image resident input block, the weights
    # and the bias -- all double-buffered by the Pallas pipeline.
    fixed = 2 * _block_bytes((H_in, W_in, Cin), dtype)
    fixed += 2 * _block_bytes((9 * Cin, Cout), dtype)
    fixed += 2 * _block_bytes((1, Cout), jnp.float32)

    need_even = pool or pre_up
    cands = [th for th in range(1, Hc + 1)
             if Hc % th == 0 and not (need_even and th % 2)]

    def step_bytes(th):
        s = _block_bytes((th + 2, Wc + 2, Cin), dtype)            # padded halo
        if pre_up:
            s += _block_bytes((th + 2, Wc, Cin), dtype)           # upsampled rows
        s += _block_bytes((th + 2, Wc, 3 * Cin), dtype)           # dx concat
        s += _block_bytes((th * Wc, 9 * Cin), dtype)              # im2col patch
        s += 2 * _block_bytes((th * Wc, Cout), jnp.float32)       # acc + epilogue
        out_rows, out_w = (th // 2, Wc // 2) if pool else (th, Wc)
        s += 2 * _block_bytes((out_rows, out_w, Cout), dtype)     # out block x2
        return s

    limit = vmem_limit - vmem_limit // 5                          # 20% headroom
    fitting = [th for th in cands
               if fixed + step_bytes(th) <= limit and step_bytes(th) <= tile_budget]
    if not fitting:
        # TODO(synk): the resident input block itself no longer fits -- switch
        # to manual halo DMA (memory_space=pl.ANY) for huge images.
        return min(cands)
    # Prefer >= 512 output pixels per step with an 8-aligned MXU M dimension.
    preferred = [th for th in fitting if th * Wc >= 512 and (th * Wc) % 8 == 0]
    return max(preferred) if preferred else max(fitting)


# ----------------------------------------------------------------------------
# Wrapper: one fused layer = one pallas_call
# ----------------------------------------------------------------------------
def conv3x3_fused(x_nhwc, w, b, *, relu=True, pre_up=False, pool=False,
                  row_tile=None):
    """One fused VGG layer: (optional fused 2x nearest upsample of the input)
    -> reflect-pad 3x3 conv (+bias, optional ReLU) -> optional 2x2 maxpool."""
    N, H_in, W_in, Cin = x_nhwc.shape
    Cout = w.shape[-1]
    assert w.shape == (3, 3, Cin, Cout), w.shape
    Hc = 2 * H_in if pre_up else H_in
    Wc = 2 * W_in if pre_up else W_in
    if not pre_up:
        assert H_in >= 2 and W_in >= 2, "reflection pad needs spatial dims >= 2"
    if pool:
        assert Hc % 2 == 0 and Wc % 2 == 0, "2x2 maxpool needs even H, W"

    vmem_limit, tile_budget = _vmem_budgets()
    if row_tile is None:
        TH = _pick_row_tile(H_in, W_in, Cin, Cout, x_nhwc.dtype,
                            pre_up=pre_up, pool=pool,
                            vmem_limit=vmem_limit, tile_budget=tile_budget)
    else:
        TH = row_tile
    assert Hc % TH == 0, (Hc, TH)
    if pool or pre_up:
        assert TH % 2 == 0, (TH, pre_up, pool)
    nT = Hc // TH

    w_flat = w.reshape(9 * Cin, Cout).astype(x_nhwc.dtype)   # (dy, dx, cin) -> K
    b_row = jnp.asarray(b, jnp.float32).reshape(1, Cout)

    if pool:
        out_shape = (N, Hc // 2, Wc // 2, Cout)
        out_block = (1, TH // 2, Wc // 2, Cout)
    else:
        out_shape = (N, Hc, Wc, Cout)
        out_block = (1, TH, Wc, Cout)

    itemsize = jnp.dtype(x_nhwc.dtype).itemsize
    out_elems = out_shape[0] * out_shape[1] * out_shape[2] * out_shape[3]
    cost = pl.CostEstimate(
        flops=2 * N * Hc * Wc * 9 * Cin * Cout,
        transcendentals=0,
        bytes_accessed=(N * H_in * W_in * Cin + 9 * Cin * Cout + out_elems) * itemsize)

    kernel = functools.partial(_conv3x3_kernel, H_in=H_in, W_in=W_in, TH=TH,
                               Cout=Cout, relu=relu, pre_up=pre_up, pool=pool)
    return pl.pallas_call(
        kernel,
        out_shape=jax.ShapeDtypeStruct(out_shape, x_nhwc.dtype),
        grid=(N, nT),
        in_specs=[
            # Whole image resident across the row-tile axis (block index does
            # not depend on t -> DMA'd only once per image).
            # TODO(synk): on v7x single-buffer this operand or use a manual
            #             halo DMA so it is never double-buffered.
            pl.BlockSpec((1, H_in, W_in, Cin), lambda n, t: (n, 0, 0, 0)),
            pl.BlockSpec((9 * Cin, Cout), lambda n, t: (0, 0)),
            pl.BlockSpec((1, Cout), lambda n, t: (0, 0)),
        ],
        out_specs=pl.BlockSpec(out_block, lambda n, t: (n, t, 0, 0)),
        compiler_params=pltpu.CompilerParams(
            dimension_semantics=("parallel", "arbitrary"),
            vmem_limit_bytes=vmem_limit),
        cost_estimate=cost,
    )(x_nhwc, w_flat, b_row)


# ----------------------------------------------------------------------------
# Model2D: parameters + forward
# ----------------------------------------------------------------------------
# Small VGG-style channel config (enc_cfg['vgg'] / dec_cfg['vgg'] are
# configurable in the original module; reduced widths used here).
ENC_CFG = [
    # (cin, cout, relu, pool_after)
    (3, 16, True, False),    # conv1_1
    (16, 16, True, True),    # conv1_2 + maxpool
    (16, 32, True, False),   # conv2_1
    (32, 32, True, True),    # conv2_2 + maxpool
    (32, 64, True, False),   # conv3_1  -> feats
]
DEC_CFG = [
    # (cin, cout, relu, pre_up) -- pre_up: the 2x nearest upsample that the
    # PyTorch module applies AFTER the previous conv is fused into THIS conv
    # (the expanded tensor never touches HBM).
    (64, 32, True, False),
    (32, 32, True, True),
    (32, 16, True, False),
    (16, 16, True, True),
    (16, 3, False, False),   # final conv -> RGB, no activation
]


def _init_conv(key, cin, cout):
    kw, kb = jax.random.split(key)
    scale = (2.0 / (9.0 * cin)) ** 0.5
    w = scale * jax.random.normal(kw, (3, 3, cin, cout), jnp.float32)
    b = 0.01 * jax.random.normal(kb, (1, cout), jnp.float32)
    return {"w": w, "b": b}


def init_model2d_params(key):
    n_enc, n_dec = len(ENC_CFG), len(DEC_CFG)
    keys = jax.random.split(key, n_enc + n_dec)
    enc = [_init_conv(keys[i], cfg[0], cfg[1]) for i, cfg in enumerate(ENC_CFG)]
    dec = [_init_conv(keys[n_enc + i], cfg[0], cfg[1]) for i, cfg in enumerate(DEC_CFG)]
    return {"encoder": enc, "decoder": dec}


def vgg_encoder(params, x_nhwc):
    h = x_nhwc
    for p, (_, _, relu, pool) in zip(params, ENC_CFG):
        h = conv3x3_fused(h, p["w"], p["b"], relu=relu, pool=pool)
    return h


def vgg_decoder(params, feats_nhwc):
    h = feats_nhwc
    for p, (_, _, relu, pre_up) in zip(params, DEC_CFG):
        h = conv3x3_fused(h, p["w"], p["b"], relu=relu, pre_up=pre_up)
    return h


def model2d_forward(params, input_dict, rgb_only=False, act_dtype=jnp.bfloat16):
    """Mirrors Model2D.forward (stylization=False, return_pyramid=False).

    input_dict['src_rgb']: (bs, 3, h, w) float32, NCHW (PyTorch convention).
    Activations between layers are stored in `act_dtype` (bf16 by default to
    halve HBM traffic on this memory-bound net); outputs are float32 NCHW.
    """
    rgb = input_dict["src_rgb"]
    x = jnp.transpose(rgb, (0, 2, 3, 1)).astype(act_dtype)     # NCHW -> NHWC
    feats = vgg_encoder(params["encoder"], x)                  # (bs, h/4, w/4, 64)
    pred = vgg_decoder(params["decoder"], feats)               # (bs, h, w, 3)
    output_dict = {"pred_rgb": jnp.transpose(pred, (0, 3, 1, 2)).astype(jnp.float32)}
    if not rgb_only:
        output_dict["pred_feats"] = jnp.transpose(feats, (0, 3, 1, 2)).astype(jnp.float32)
    return output_dict


# ----------------------------------------------------------------------------
# Pure-JAX reference (correctness checks only; mirrors the PyTorch module,
# with the upsample as a separate op AFTER the conv as in the original)
# ----------------------------------------------------------------------------
def _ref_conv(x, w, b, relu):
    xp = jnp.pad(x, ((0, 0), (1, 1), (1, 1), (0, 0)), mode="reflect")
    y = jax.lax.conv_general_dilated(
        xp, w, window_strides=(1, 1), padding="VALID",
        dimension_numbers=("NHWC", "HWIO", "NHWC"))
    y = y + jnp.reshape(b, (1, 1, 1, -1))
    return jnp.maximum(y, 0.0) if relu else y


def _ref_pool(x):
    N, H, W, C = x.shape
    return jnp.max(x.reshape(N, H // 2, 2, W // 2, 2, C), axis=(2, 4))


def _ref_up(x):
    return jnp.repeat(jnp.repeat(x, 2, axis=1), 2, axis=2)


def _reference_forward(params, rgb_nchw):
    h = jnp.transpose(rgb_nchw, (0, 2, 3, 1))
    for p, (_, _, relu, pool) in zip(params["encoder"], ENC_CFG):
        h = _ref_conv(h, p["w"], p["b"], relu)
        if pool:
            h = _ref_pool(h)
    feats = h
    n = len(DEC_CFG)
    for i, (p, (_, _, relu, _)) in enumerate(zip(params["decoder"], DEC_CFG)):
        h = _ref_conv(h, p["w"], p["b"], relu)
        # Original module applies the upsample AFTER this conv; the Pallas
        # path fuses it into the next conv (pre_up of layer i+1).
        if i + 1 < n and DEC_CFG[i + 1][3]:
            h = _ref_up(h)
    return {"pred_rgb": jnp.transpose(h, (0, 3, 1, 2)),
            "pred_feats": jnp.transpose(feats, (0, 3, 1, 2))}


# ----------------------------------------------------------------------------
if __name__ == "__main__":
    key = jax.random.PRNGKey(0)
    k_x, k_w, k_b, k_param, k_rgb = jax.random.split(key, 5)

    # 1) Fused-layer checks vs pure-JAX reference; row_tile forced so the tiled
    #    boundary-reflection and fused-upsample halo paths are exercised.
    x = jax.random.normal(k_x, (2, 16, 16, 8), jnp.float32)
    w = 0.1 * jax.random.normal(k_w, (3, 3, 8, 16), jnp.float32)
    b = 0.1 * jax.random.normal(k_b, (16,), jnp.float32)

    got = jax.block_until_ready(conv3x3_fused(x, w, b, relu=True, row_tile=4))
    want = _ref_conv(x, w, b, True)
    assert float(jnp.max(jnp.abs(got - want))) < 2e-3, "plain conv mismatch"

    got = jax.block_until_ready(
        conv3x3_fused(x, w, b, relu=True, pool=True, row_tile=4))
    want = _ref_pool(_ref_conv(x, w, b, True))
    assert float(jnp.max(jnp.abs(got - want))) < 2e-3, "conv+pool mismatch"

    xs = jax.random.normal(k_x, (2, 8, 8, 8), jnp.float32)
    got = jax.block_until_ready(
        conv3x3_fused(xs, w, b, relu=True, pre_up=True, row_tile=4))
    want = _ref_conv(_ref_up(xs), w, b, True)
    assert float(jnp.max(jnp.abs(got - want))) < 2e-3, "fused upsample+conv mismatch"

    # 2) End-to-end Model2D forward (f32 activation storage) vs reference.
    params = init_model2d_params(k_param)
    rgb = jax.random.uniform(k_rgb, (2, 3, 16, 16), jnp.float32)   # NCHW
    ref = _reference_forward(params, rgb)
    out32 = model2d_forward(params, {"src_rgb": rgb, "style": None},
                            act_dtype=jnp.float32)
    for name in ("pred_rgb", "pred_feats"):
        err = float(jnp.max(jnp.abs(out32[name] - ref[name])))
        assert err < 3e-3, (name, err)

    # 3) Default (bf16 activation storage) path, jitted; loose-tolerance check
    #    against the f32 reference to bound bf16 drift over 10 layers.
    fwd = jax.jit(lambda p, r: model2d_forward(p, {"src_rgb": r, "style": None}))
    out = jax.tree_util.tree_map(jax.block_until_ready, fwd(params, rgb))
    assert out["pred_rgb"].shape == (2, 3, 16, 16), out["pred_rgb"].shape
    assert out["pred_feats"].shape == (2, 64, 4, 4), out["pred_feats"].shape
    for name in ("pred_rgb", "pred_feats"):
        assert bool(jnp.all(jnp.isfinite(out[name]))), name
        err = float(jnp.max(jnp.abs(out[name] - ref[name])))
        assert err < 0.25, (name, err)

    print("KERNEL_OK")
</pallas_src>

<mosaic_0001>
module attributes {stable_mosaic.version = 11 : i64} {
  func.func @_conv3x3_kernel(%arg0: i32, %arg1: i32, %arg2: memref<1x16x16x8xf32, #tpu.memory_space<vmem>>, %arg3: memref<72x16xf32, #tpu.memory_space<vmem>>, %arg4: memref<1x16xf32, #tpu.memory_space<vmem>>, %arg5: memref<1x4x16x16xf32, #tpu.memory_space<vmem>>) attributes {dimension_semantics = [#tpu.dimension_semantics<parallel>, #tpu.dimension_semantics<arbitrary>], iteration_bounds = array<i64: 2, 4>, scalar_prefetch = 0 : i64, scratch_operands = 0 : i64, tpu.core_type = #tpu.core_type<tc>, window_params = [{transform_indices = @transform_0, window_bounds = array<i64: 1, 16, 16, 8>}, {pipeline_mode = #tpu.pipeline_mode<synchronous>, transform_indices = @transform_1, window_bounds = array<i64: 72, 16>}, {pipeline_mode = #tpu.pipeline_mode<synchronous>, transform_indices = @transform_2, window_bounds = array<i64: 1, 16>}, {transform_indices = @transform_3, window_bounds = array<i64: 1, 4, 16, 16>}]} {
    %c4_i32 = arith.constant 4 : i32
    %0 = arith.muli %arg1, %c4_i32 : i32
    %c0_i32 = arith.constant 0 : i32
    %1 = arith.cmpi eq, %0, %c0_i32 : i32
    %c1_i32 = arith.constant 1 : i32
    %2 = arith.subi %0, %c1_i32 : i32
    %c1_i32_0 = arith.constant 1 : i32
    %3 = arith.select %1, %c1_i32_0, %2 : i32
    %c4_i32_1 = arith.constant 4 : i32
    %4 = arith.addi %0, %c4_i32_1 : i32
    %c16_i32 = arith.constant 16 : i32
    %5 = arith.cmpi eq, %4, %c16_i32 : i32
    %c4_i32_2 = arith.constant 4 : i32
    %6 = arith.addi %0, %c4_i32_2 : i32
    %c14_i32 = arith.constant 14 : i32
    %7 = arith.select %5, %c14_i32, %6 : i32
    %c0 = arith.constant 0 : index
    %8 = arith.index_cast %3 : i32 to index
    %c0_3 = arith.constant 0 : index
    %c0_4 = arith.constant 0 : index
    %9 = vector.load %arg2[%c0, %8, %c0_3, %c0_4] : memref<1x16x16x8xf32, #tpu.memory_space<vmem>>, vector<1x1x16x8xf32>
    %10 = vector.shape_cast %9 : vector<1x1x16x8xf32> to vector<1x16x8xf32>
    %c0_5 = arith.constant 0 : index
    %11 = arith.index_cast %0 : i32 to index
    %c0_6 = arith.constant 0 : index
    %c0_7 = arith.constant 0 : index
    %12 = vector.load %arg2[%c0_5, %11, %c0_6, %c0_7] : memref<1x16x16x8xf32, #tpu.memory_space<vmem>>, vector<1x4x16x8xf32>
    %13 = vector.shape_cast %12 : vector<1x4x16x8xf32> to vector<4x16x8xf32>
    %c0_8 = arith.constant 0 : index
    %14 = arith.index_cast %7 : i32 to index
    %c0_9 = arith.constant 0 : index
    %c0_10 = arith.constant 0 : index
    %15 = vector.load %arg2[%c0_8, %14, %c0_9, %c0_10] : memref<1x16x16x8xf32, #tpu.memory_space<vmem>>, vector<1x1x16x8xf32>
    %16 = vector.shape_cast %15 : vector<1x1x16x8xf32> to vector<1x16x8xf32>
    %17 = tpu.concatenate %10, %13, %16 in 0 : vector<1x16x8xf32>, vector<4x16x8xf32>, vector<1x16x8xf32> -> vector<6x16x8xf32>
    %18 = vector.extract_strided_slice %17 {offsets = [0, 1, 0], sizes = [6, 1, 8], strides = [1, 1, 1]} : vector<6x16x8xf32> to vector<6x1x8xf32>
    %19 = vector.extract_strided_slice %17 {offsets = [0, 14, 0], sizes = [6, 1, 8], strides = [1, 1, 1]} : vector<6x16x8xf32> to vector<6x1x8xf32>
    %20 = tpu.concatenate %18, %17, %19 in 1 : vector<6x1x8xf32>, vector<6x16x8xf32>, vector<6x1x8xf32> -> vector<6x18x8xf32>
    %21 = vector.extract_strided_slice %20 {offsets = [0, 0, 0], sizes = [6, 16, 8], strides = [1, 1, 1]} : vector<6x18x8xf32> to vector<6x16x8xf32>
    %22 = vector.extract_strided_slice %20 {offsets = [0, 1, 0], sizes = [6, 16, 8], strides = [1, 1, 1]} : vector<6x18x8xf32> to vector<6x16x8xf32>
    %23 = vector.extract_strided_slice %20 {offsets = [0, 2, 0], sizes = [6, 16, 8], strides = [1, 1, 1]} : vector<6x18x8xf32> to vector<6x16x8xf32>
    %24 = tpu.concatenate %21, %22, %23 in 2 : vector<6x16x8xf32>, vector<6x16x8xf32>, vector<6x16x8xf32> -> vector<6x16x24xf32>
    %25 = vector.extract_strided_slice %24 {offsets = [0, 0, 0], sizes = [4, 16, 24], strides = [1, 1, 1]} : vector<6x16x24xf32> to vector<4x16x24xf32>
    %26 = vector.extract_strided_slice %24 {offsets = [1, 0, 0], sizes = [4, 16, 24], strides = [1, 1, 1]} : vector<6x16x24xf32> to vector<4x16x24xf32>
    %27 = vector.extract_strided_slice %24 {offsets = [2, 0, 0], sizes = [4, 16, 24], strides = [1, 1, 1]} : vector<6x16x24xf32> to vector<4x16x24xf32>
    %28 = tpu.concatenate %25, %26, %27 in 2 : vector<4x16x24xf32>, vector<4x16x24xf32>, vector<4x16x24xf32> -> vector<4x16x72xf32>
    %29 = vector.shape_cast %28 : vector<4x16x72xf32> to vector<64x72xf32>
    %c0_11 = arith.constant 0 : index
    %c0_12 = arith.constant 0 : index
    %30 = vector.load %arg3[%c0_11, %c0_12] : memref<72x16xf32, #tpu.memory_space<vmem>>, vector<72x16xf32>
    %cst = arith.constant dense<0.000000e+00> : vector<64x16xf32>
    %31 = tpu.matmul %29, %30, %cst {dimension_numbers = #tpu.dot_dimension_numbers<[1], [0], [0], [1], [0, 0, 1, 1], [], []>} : vector<64x72xf32>, vector<72x16xf32>, vector<64x16xf32> -> vector<64x16xf32>
    %c0_13 = arith.constant 0 : index
    %c0_14 = arith.constant 0 : index
    %32 = vector.load %arg4[%c0_13, %c0_14] : memref<1x16xf32, #tpu.memory_space<vmem>>, vector<1x16xf32>
    %33 = vector.broadcast %32 : vector<1x16xf32> to vector<64x16xf32>
    %34 = arith.addf %31, %33 : vector<64x16xf32>
    %cst_15 = arith.constant 0.000000e+00 : f32
    %35 = vector.broadcast %cst_15 : f32 to vector<64x16xf32>
    %36 = arith.maximumf %34, %35 : vector<64x16xf32>
    %37 = vector.shape_cast %36 : vector<64x16xf32> to vector<1x4x16x16xf32>
    %c0_16 = arith.constant 0 : index
    %c0_17 = arith.constant 0 : index
    %c0_18 = arith.constant 0 : index
    %c0_19 = arith.constant 0 : index
    %38 = vector.load %arg5[%c0_16, %c0_17, %c0_18, %c0_19] : memref<1x4x16x16xf32, #tpu.memory_space<vmem>>, vector<1x4x16x16xf32>
    tpu.vector_store %arg5[%c0_16, %c0_17, %c0_18, %c0_19], %37 {strides = array<i32>} : memref<1x4x16x16xf32, #tpu.memory_space<vmem>>, vector<1x4x16x16xf32>,
    return
  }
  func.func @transform_0(%arg0: i32, %arg1: i32) -> (i32, i32, i32, i32) {
    %c0_i32 = arith.constant 0 : i32
    %c0_i32_0 = arith.constant 0 : i32
    %c0_i32_1 = arith.constant 0 : i32
    %c0_i32_2 = arith.constant 0 : i32
    return %arg0, %c0_i32, %c0_i32_0, %c0_i32_1 : i32, i32, i32, i32
  }
  func.func @transform_1(%arg0: i32, %arg1: i32) -> (i32, i32) {
    %c0_i32 = arith.constant 0 : i32
    %c0_i32_0 = arith.constant 0 : i32
    %c0_i32_1 = arith.constant 0 : i32
    return %c0_i32, %c0_i32_0 : i32, i32
  }
  func.func @transform_2(%arg0: i32, %arg1: i32) -> (i32, i32) {
    %c0_i32 = arith.constant 0 : i32
    %c0_i32_0 = arith.constant 0 : i32
    %c0_i32_1 = arith.constant 0 : i32
    return %c0_i32, %c0_i32_0 : i32, i32
  }
  func.func @transform_3(%arg0: i32, %arg1: i32) -> (i32, i32, i32, i32) {
    %c0_i32 = arith.constant 0 : i32
    %c0_i32_0 = arith.constant 0 : i32
    %c0_i32_1 = arith.constant 0 : i32
    return %arg0, %arg1, %c0_i32, %c0_i32_0 : i32, i32, i32, i32
  }
}

</mosaic_0001>

<bundles_post_ra>
// kernel: tpu_custom_call.1
= control target key start
LH: loop header
LB: loop body
LE: loop exit
PB: predicated region body
PF: predicated region fallthrough
CT: control target
= control target key end

     0   :  { %8 = vsyncpa [#allocation3], 0  ;;  %s1452_s0 = inlined_call_operand.vmem [shape: f32[2,16,16,8], index: 0, kind: input, shape index: {}]   ;;  %s1453_s1 = inlined_call_operand.vmem [shape: f32[72,16], index: 1, kind: input, shape index: {}]   ;;  %s1454_s2 = inlined_call_operand.vmem [shape: f32[1,16], index: 2, kind: input, shape index: {}]   ;;  %s1455_s3 = inlined_call_operand.hbm [shape: f32[2,16,16,16], index: 3, kind: output, shape index: {}]  }
   0x1   :  { %10 = vsyncpa [#allocation3 + $0x1], 0  ;;  %s994_s12 = smov 0   ;;  %s996_s13 = smov 0  }
   0x2   :  { %s998_s14 = smov 0   ;;  %s1000_s15 = smov 0  }
   0x3   :  { %s1002_s16 = smov 0   ;;  %s1004_s17 = smov 0  }
   0x4   :  { %s1006_s18 = smov 0   ;;  %s1008_s19 = smov 0  }
   0x5 LB: > { %s738_s20 = sadd.s32 4294967295, %s967_s19   ;;  %s739_s21 = sadd.s32 4294967294, %s967_s19   ;;  %s967_s19 = sphi %s1008_s19, %s16_s19   ;;  %s963_s18 = sphi %s1006_s18, %s1464_s18   ;;  %s959_s17 = sphi %s1004_s17, %s1463_s17   ;;  %s955_s16 = sphi %s1002_s16, %s1462_s16   ;;  %s951_s15 = sphi %s1000_s15, %s1461_s15   ;;  %s947_s14 = sphi %s998_s14, %s1460_s14   ;;  %s943_s13 = sphi %s996_s13, %s1459_s13   ;;  %s939_s12 = sphi %s994_s12, %s1458_s12  }
   0x6   : > { %s25_s22 = sadd.s32 1, %s959_s17  ;;  %s28_s23 = sadd.s32 1, %s963_s18 }
   0x7   : > { %p26_p0 = scmp.ge.s32.totalorder %s25_s22, 4  ;;  %p115_p1 = scmp.ne.s32.totalorder %s947_s14, %s943_s13 }
   0x8   : > { %p116_p2 = scmp.eq.s32.totalorder %s738_s20, 7  ;;  %p121_p5 = scmp.ne.s32.totalorder %s943_s13, %s939_s12 }
   0x9   : > { %s1466_s22 = smov (%p26_p0, %s25_s22), 0  ;;  %s1468_s23 = smov (!%p26_p0, %s28_s23), %s963_s18 }
   0xa   : > { %s101_s24 = ssub.s32 %s959_s17, %s1466_s22  ;;  %p1045_p3 = por %p116_p2, %p115_p1 }
   0xb   : > { %p30_p4 = scmp.ge.s32.totalorder %s1468_s23, 2  ;;  %p122_p6 = scmp.eq.s32.totalorder %s739_s21, 7 }
   0xc   : > { %p742_p7 = scmp.ge.s32.totalorder %s967_s19, 1  ;;  %p154_p9 = scmp.lt.s32.totalorder %s967_s19, 9 }
   0xd   : > { %s1470_s23 = smov (%p30_p4, %s1468_s23), 0  ;;  %p1054_p8 = por %p122_p6, %p121_p5 }
   0xe   : > { %s100_s27 = ssub.s32 %s963_s18, %s1470_s23  ;;  %s105_s28 = sadd.s32 1, %s947_s14 }
   0xf   : > { %s102_s29 = sor.u32 %s101_s24, %s100_s27  ;;  %p155_p10 = pnand %p742_p7, %p154_p9 }
  0x10   : > { %p103_p11 = scmp.eq.s32.totalorder %s102_s29, 0  ;;  %p178_p12 = scmp.lt.s32.totalorder (!%p155_p10), %s955_s16, 1 }
  0x11   : > { %158 = sbr.rel (%p155_p10) target bundleno = 464 (0x1d0), region = 32  ;;  %s767_s5 = sshll.u32 (!%p155_p10), %s951_s15, 6 }
  0x12   : > { %s1063_s30 = scalar_select %p103_p11, %s947_s14, %s105_s28  }
  0x13   : > { %s1069_s6 = sshll.u32 (!%p155_p10), %s951_s15, 2  ;;  %s969_s27 = smov (!%p155_p10), 16  }
  0x14   : > { %s188_s8 = sadd.s32 (!%p155_p10), 4, %s1069_s6  ;;  %s970_s28 = smov (!%p155_p10), 8  }
  0x15   : > { %p189_p13 = scmp.eq.s32.totalorder (!%p155_p10), %s188_s8, 16  ;;  %p185_p0 = scmp.eq.s32.totalorder (!%p155_p10), %s1069_s6, 0 }
  0x16   : > { %s179_s4 = scalar_select %p178_p12, %s955_s16, 1  ;;  %vm233_vm0 = vcmask 1040384   ;;  %vm373_vm1 = vcmask 1045504   ;;  %vm306_vm2 = vcmask 1046528   ;;  %vm440_vm3 = vcmask 64512  }
  0x17   : > { %s1472_s8 = smov (%p189_p13, %s188_s8), 14  ;;  %s747_s29 = sadd.s32 4294967295, %s1069_s6  ;;  %vm453_vm4 = vcmask 130048   ;;  %vm524_vm5 = vcmask 195584   ;;  %vm533_vm6 = vcmask 392192   ;;  %vm555_vm7 = vcmask 588800  }
  0x18   : > { %s766_s7 = sshll.u32 %s179_s4, 8  ;;  %s750_s21 = sshll.u32 %s1472_s8, 4 }
  0x19   : > { %s1075_s11 = scalar_lea.vmem %s1452_s0, %s766_s7  ;;  %s1474_s29 = smov (%p185_p0, %s747_s29), 1 }
  0x1a   : > { %s1078_s20 = scalar_lea.vmem %s1075_s11, %s767_s5  ;;  %s206_s24 = scalar_lea.vmem %s1075_s11, %s750_s21 }
  0x1b   : > { %v201_v0 = vld [vmem:[%s1078_s20 + $0x20] sm:$0xff]  ;;  %v1082_v1 = vld [vmem:[%s1078_s20 + $0x28] sm:$0xff]  ;;  %v203_v2 = vld [vmem:[%s1078_s20 + $0x30] sm:$0xff]  ;;  %s748_s4 = sshll.u32 %s1474_s29, 4  ;;  %s971_s6 = smov 24  }
  0x1c   : > { %v218_v3 = vrot.slane %v201_v0, 1  ;;  %v243_v4 = vrot.slane %v201_v0, 7  ;;  %v244_v5 = vrot.slane %v1082_v1, 7  ;;  %v1087_v6 = vld [vmem:[%s1078_s20 + $0x38] sm:$0xff]  ;;  %v219_v7 = vrot.slane %v203_v2, 1  ;;  %v199_v12 = vld [vmem:[%s1078_s20 + $0x10] sm:$0xff]  ;;  %s192_s5 = scalar_lea.vmem %s1075_s11, %s748_s4 }
  0x1d   : > { %v246_v8 = vrot.slane %v203_v2, 7  ;;  %v247_v9 = vrot.slane %v1087_v6, 7  ;;  %v207_v17 = vld [vmem:[%s206_s24] sm:$0xff]  ;;  %v1104_v18 = vld [vmem:[%s206_s24 + $0x8] sm:$0xff]  ;;  %v1122_v26 = vld [vmem:[%s1078_s20 + $0x18] sm:$0xff]  ;;  %v217_v30 = vrot.slane %v199_v12, 1 }
  0x1e   : > { %v1093_v10 = vsel %vm233_vm0, %v243_v4, %v244_v5  ;;  %v1096_v11 = vsel %vm233_vm0, %v218_v3, %v243_v4  ;;  %v220_v19 = vrot.slane %v207_v17, 1  ;;  %v249_v20 = vrot.slane %v207_v17, 7  ;;  %v197_v27 = vld [vmem:[%s1078_s20] sm:$0xff]  ;;  %v1134_v31 = vld [vmem:[%s1078_s20 + $0x8] sm:$0xff]  ;;  %s972_s7 = smov 48   ;;  %s175_s21 = sand.u32 1, %s943_s13  }
  0x1f   : > { %v389_v13 = vrot.slane %v1096_v11, 2  ;;  %v390_v14 = vrot.slane %v1093_v10, 2  ;;  %v322_v15 = vrot.slane %v1096_v11, 1  ;;  %v323_v16 = vrot.slane %v1093_v10, 1  ;;  %s743_s29 = sshll.u32 %s175_s21, 6 }
  0x20   : > { %v250_v21 = vrot.slane %v1104_v18, 7  ;;  %v1110_v22 = vsel %vm233_vm0, %v246_v8, %v247_v9  ;;  %v1119_v25 = vsel %vm233_vm0, %v219_v7, %v246_v8  ;;  %v1131_v29 = vsel %vm233_vm0, %v220_v19, %v249_v20  ;;  %s1387_s4 = scalar_lea.vmem [#allocation2], %s743_s29 }
  0x21   : > { %v391_v23 = vsel %vm373_vm1, %v389_v13, %v390_v14  ;;  %v324_v24 = vsel %vm306_vm2, %v322_v15, %v323_v16  ;;  %v332_v32 = vrot.slane %v1131_v29, 1  ;;  %v327_v34 = vrot.slane %v1119_v25, 1  ;;  %s653_s20 = sshll.u32 %s1387_s4, 4  ;;  %s654_s20 = int_to_ptr.vmem [resolvable:$true] %s653_s20 }
  0x22   : > { %416 = vrot.lane.b32.xlu1 %v391_v23, %s969_s27  ;;  %349 = vrot.lane.b32.xlu0 %v324_v24, %s970_s28  ;;  %v1128_v28 = vsel %vm233_vm0, %v249_v20, %v250_v21  ;;  %v328_v35 = vrot.slane %v1110_v22, 1  ;;  %v240_v36 = vrot.slane %v199_v12, 7  ;;  %v241_v37 = vrot.slane %v1122_v26, 7 }
  0x23   : > { %v333_v33 = vrot.slane %v1128_v28, 1  ;;  %v216_v38 = vrot.slane %v197_v27, 1  ;;  %v237_v39 = vrot.slane %v197_v27, 7  ;;  %v238_v40 = vrot.slane %v1134_v31, 7 }
  0x24   : > { %v394_v41 = vrot.slane %v1119_v25, 2  ;;  %v395_v42 = vrot.slane %v1110_v22, 2  ;;  %v329_v44 = vsel %vm306_vm2, %v327_v34, %v328_v35  ;;  %v1150_v46 = vsel %vm233_vm0, %v240_v36, %v241_v37  ;;  %v194_v34 = vld [vmem:[%s192_s5 + $0x8] sm:$0xff] }
  0x25   : > { %v334_v43 = vsel %vm306_vm2, %v332_v32, %v333_v33  ;;  %v1153_v47 = vsel %vm233_vm0, %v217_v30, %v240_v36  ;;  %v1156_v48 = vsel %vm233_vm0, %v237_v39, %v238_v40  ;;  %v1159_v49 = vsel %vm233_vm0, %v216_v38, %v237_v39 }
  0x26   : > { %v396_v45 = vsel %vm373_vm1, %v394_v41, %v395_v42  ;;  %v399_v50 = vrot.slane %v1131_v29, 2  ;;  %v400_v51 = vrot.slane %v1128_v28, 2  ;;  %v317_v52 = vrot.slane %v1153_v47, 1 }
  0x27   : > { %420 = vrot.lane.b32.xlu2 %v396_v45, %s969_s27  ;;  %v318_v53 = vrot.slane %v1150_v46, 1  ;;  %v312_v54 = vrot.slane %v1159_v49, 1  ;;  %v313_v55 = vrot.slane %v1156_v48, 1  ;;  %v273_v56 = vrot.slane %v1082_v1, 5 }
  0x28   : > { %v401_v57 = vsel %vm373_vm1, %v399_v50, %v400_v51  ;;  %v379_v61 = vrot.slane %v1159_v49, 2  ;;  %v380_v62 = vrot.slane %v1156_v48, 2  ;;  %v274_v63 = vrot.slane %v1087_v6, 5 }
  0x29   : > { %v319_v58 = vsel %vm306_vm2, %v317_v52, %v318_v53  ;;  %v314_v59 = vsel %vm306_vm2, %v312_v54, %v313_v55  ;;  %v291_v60 = vsel %vm233_vm0, %v244_v5, %v273_v56  ;;  %v384_v2 = vrot.slane %v1153_v47, 2 }
  0x2a   : > { %357 = vrot.lane.b32.xlu1 %v334_v43, %s970_s28  ;;  %353 = vrot.lane.b32.xlu0 %v329_v44, %s970_s28  ;;  %v325_v0 = vrot.slane %v291_v60, 1  ;;  %v385_v1 = vrot.slane %v1150_v46, 2  ;;  %v275_v3 = vrot.slane %v1104_v18, 5  ;;  %v381_v4 = vsel %vm373_vm1, %v379_v61, %v380_v62 }
  0x2b   : > { %v292_v5 = vsel %vm233_vm0, %v247_v9, %v274_v63  ;;  %v392_v15 = vrot.slane %v291_v60, 2  ;;  %v271_v6 = vrot.slane %v1134_v31, 5  ;;  %v272_v24 = vrot.slane %v1122_v26, 5 }
  0x2c   : > { %v326_v7 = vsel %vm306_vm2, %v323_v16, %v325_v0  ;;  %v386_v8 = vsel %vm373_vm1, %v384_v2, %v385_v1  ;;  %v293_v12 = vsel %vm233_vm0, %v250_v21, %v275_v3  ;;  %v330_v13 = vrot.slane %v292_v5, 1 }
  0x2d   : > { %v335_v17 = vrot.slane %v293_v12, 1  ;;  %v393_v16 = vsel %vm373_vm1, %v390_v14, %v392_v15  ;;  %v289_v19 = vsel %vm233_vm0, %v238_v40, %v271_v6  ;;  %v397_v20 = vrot.slane %v292_v5, 2 }
  0x2e   : > { %v331_v9 = vsel %vm306_vm2, %v328_v35, %v330_v13  ;;  %v315_v21 = vrot.slane %v289_v19, 1  ;;  %v402_v23 = vrot.slane %v293_v12, 2  ;;  %v290_v31 = vsel %vm233_vm0, %v241_v37, %v272_v24 }
  0x2f   : > { %424 = vrot.lane.b32.xlu2 %v401_v57, %s969_s27  ;;  %v336_v18 = vsel %vm306_vm2, %v333_v33, %v335_v17  ;;  %v398_v27 = vsel %vm373_vm1, %v395_v42, %v397_v20  ;;  %v320_v32 = vrot.slane %v290_v31, 1  ;;  %v193_v33 = vld [vmem:[%s192_s5] sm:$0xff]  ;;  %v387_v35 = vrot.slane %v290_v31, 2  ;;  %s768_s5 = sshll.u32 %s951_s15, 3  ;;  %s638_s15 = scalar_lea.sflag [#allocation3], %s175_s21 }
  0x30   : > { %v316_v14 = vsel %vm306_vm2, %v313_v55, %v315_v21  ;;  %v403_v30 = vsel %vm373_vm1, %v400_v51, %v402_v23  ;;  %v382_v36 = vrot.slane %v289_v19, 2  ;;  %v215_v38 = vrot.slane %v193_v33, 1 }
  0x31   : > { %v234_v39 = vrot.slane %v193_v33, 7  ;;  %v235_v40 = vrot.slane %v194_v34, 7  ;;  %v321_v41 = vsel %vm306_vm2, %v318_v53, %v320_v32  ;;  %v388_v26 = vsel %vm373_vm1, %v385_v1, %v387_v35  ;;  %v549_v35 = vld [vmem:[%s1453_s1 + $0x38] sm:$0xff] }
  0x32   : > { %345 = vrot.lane.b32.xlu1 %v319_v58, %s970_s28  ;;  %341 = vrot.lane.b32.xlu0 %v314_v59, %s970_s28  ;;  %v383_v37 = vsel %vm373_vm1, %v380_v62, %v382_v36  ;;  %v270_v54 = vrot.slane %v194_v34, 5  ;;  %v550_v34 = vld [vmem:[%s1453_s1 + $0x40] sm:$0xff]  ;;  %v547_v36 = vld [vmem:[%s1453_s1 + $0x28] sm:$0xff] }
  0x33   : > { %v1226_v42 = vsel %vm233_vm0, %v234_v39, %v235_v40  ;;  %v1229_v43 = vsel %vm233_vm0, %v215_v38, %v234_v39  ;;  %770 = vmatpush.msra.mxu2 %v550_v34  ;;  %771 = vmatpush.msra.mxu3 %v550_v34  ;;  %v546_v38 = vld [vmem:[%s1453_s1 + $0x20] sm:$0xff]  ;;  %v545_v39 = vld [vmem:[%s1453_s1 + $0x18] sm:$0xff] }
  0x34   : > { %v307_v44 = vrot.slane %v1229_v43, 1  ;;  %v308_v45 = vrot.slane %v1226_v42, 1  ;;  %v374_v50 = vrot.slane %v1229_v43, 2  ;;  %v375_v51 = vrot.slane %v1226_v42, 2  ;;  %587 = vmatpush.msra.mxu0 %v550_v34  ;;  %769 = vmatpush.msra.mxu1 %v550_v34 }
  0x35   : > { %v288_v55 = vsel %vm233_vm0, %v235_v40, %v270_v54  ;;  %773 = vmatpush.msra.mxu2 %v549_v35  ;;  %774 = vmatpush.msra.mxu3 %v549_v35  ;;  %v544_v40 = vld [vmem:[%s1453_s1 + $0x10] sm:$0xff] }
  0x36   : > { %v309_v52 = vsel %vm306_vm2, %v307_v44, %v308_v45  ;;  %v376_v53 = vsel %vm373_vm1, %v374_v50, %v375_v51  ;;  %v310_v56 = vrot.slane %v288_v55, 1  ;;  %v377_v24 = vrot.slane %v288_v55, 2  ;;  %588 = vmatpush.msra.mxu0 %v549_v35  ;;  %772 = vmatpush.msra.mxu1 %v549_v35 }
  0x37   : > { %408 = vrot.lane.b32.xlu2 %v381_v4, %s969_s27 }
  0x38   : > { %v311_v57 = vsel %vm306_vm2, %v308_v45, %v310_v56 }
  0x3a   : > { %351 = vrot.lane.b32.xlu1 %v326_v7, %s970_s28  ;;  %412 = vrot.lane.b32.xlu0 %v386_v8, %s969_s27 }
  0x3f   : > { %355 = vrot.lane.b32.xlu2 %v331_v9, %s970_s28 }
  0x42   : > { %418 = vrot.lane.b32.xlu1 %v393_v16, %s969_s27  ;;  %359 = vrot.lane.b32.xlu0 %v336_v18, %s970_s28 }
  0x47   : > { %422 = vrot.lane.b32.xlu2 %v398_v27, %s969_s27 }
  0x4a   : > { %343 = vrot.lane.b32.xlu1 %v316_v14, %s970_s28  ;;  %426 = vrot.lane.b32.xlu0 %v403_v30, %s969_s27 }
  0x4f   : > { %347 = vrot.lane.b32.xlu2 %v321_v41, %s970_s28  ;;  %v543_v41 = vld [vmem:[%s1453_s1 + $0x8] sm:$0xff] }
  0x52   : > { %414 = vrot.lane.b32.xlu1 %v388_v26, %s969_s27  ;;  %410 = vrot.lane.b32.xlu0 %v383_v37, %s969_s27  ;;  %v542_v26 = vld [vmem:[%s1453_s1] sm:$0xff] }
  0x5a   : > { %337 = vrot.lane.b32.xlu0 %v309_v52, %s970_s28  ;;  %404 = vrot.lane.b32.xlu1 %v376_v53, %s969_s27 }
  0x62   : > { %339 = vrot.lane.b32.xlu1 %v311_v57, %s970_s28 }
  0x81   : > { %v421_v58 = vpop.permute.xlu2 %420 }
  0x89   : > { %v425_v59 = vpop.permute.xlu2 %424 }
  0x91   : > { %v409_v0 = vpop.permute.xlu2 %408 }
  0x94   : > { %v417_v60 = vpop.permute.xlu1 %416  ;;  %v350_v61 = vpop.permute.xlu0 %349 }
  0x95   : > { %v447_v62 = vsel %vm440_vm3, %v1096_v11, %v350_v61 }
  0x96   : > { %v1249_v63 = vsel %vm453_vm4, %v447_v62, %v417_v60 }
  0x97   : > { %482 = vrot.lane.b32.xlu2 %v1249_v63, %s971_s6 }
  0x99   : > { %v356_v12 = vpop.permute.xlu2 %355 }
  0x9c   : > { %v358_v2 = vpop.permute.xlu1 %357  ;;  %v354_v1 = vpop.permute.xlu0 %353 }
  0x9d   : > { %v449_v3 = vsel %vm440_vm3, %v1119_v25, %v354_v1 }
  0x9e   : > { %v462_v4 = vsel %vm453_vm4, %v449_v3, %v421_v58 }
  0x9f   : > { %508 = vrot.lane.b32.xlu1 %v462_v4, %s972_s7  ;;  %486 = vrot.lane.b32.xlu0 %v462_v4, %s971_s6 }
  0xa1   : > { %v423_v6 = vpop.permute.xlu2 %422 }
  0xa4   : > { %v346_v11 = vpop.permute.xlu1 %345  ;;  %v342_v5 = vpop.permute.xlu0 %341 }
  0xa5   : > { %v443_v7 = vsel %vm440_vm3, %v1159_v49, %v342_v5  ;;  %v445_v25 = vsel %vm440_vm3, %v1153_v47, %v346_v11  ;;  %v450_v49 = vsel %vm440_vm3, %v1110_v22, %v356_v12  ;;  %v451_v22 = vsel %vm440_vm3, %v1131_v29, %v358_v2 }
  0xa6   : > { %v1261_v8 = vsel %vm453_vm4, %v443_v7, %v409_v0  ;;  %v463_v9 = vsel %vm453_vm4, %v450_v49, %v423_v6  ;;  %v378_v29 = vsel %vm373_vm1, %v375_v51, %v377_v24 }
  0xa7   : > { %474 = vrot.lane.b32.xlu2 %v1261_v8, %s971_s6 }
  0xa9   : > { %v348_v23 = vpop.permute.xlu2 %347 }
  0xaa   : > { %v446_v14 = vsel %vm440_vm3, %v1150_v46, %v348_v23 }
  0xac   : > { %v352_v13 = vpop.permute.xlu1 %351  ;;  %v413_v15 = vpop.permute.xlu0 %412 }
  0xad   : > { %v1268_v17 = vsel %vm453_vm4, %v445_v25, %v413_v15  ;;  %v448_v47 = vsel %vm440_vm3, %v1093_v10, %v352_v13  ;;  %v464_v10 = vsel %vm453_vm4, %v451_v22, %v425_v59 }
  0xae   : > { %500 = vrot.lane.b32.xlu1 %v1268_v17, %s972_s7  ;;  %478 = vrot.lane.b32.xlu0 %v1268_v17, %s971_s6 }
  0xaf   : > { %504 = vrot.lane.b32.xlu2 %v1249_v63, %s972_s7 }
  0xb4   : > { %v419_v16 = vpop.permute.xlu1 %418  ;;  %v360_v18 = vpop.permute.xlu0 %359 }
  0xb5   : > { %v1282_v19 = vsel %vm453_vm4, %v448_v47, %v419_v16  ;;  %v452_v46 = vsel %vm440_vm3, %v1128_v28, %v360_v18  ;;  %v548_v28 = vld [vmem:[%s1453_s1 + $0x30] sm:$0xff] }
  0xb6   : > { %488 = vrot.lane.b32.xlu1 %v463_v9, %s971_s6  ;;  %484 = vrot.lane.b32.xlu0 %v1282_v19, %s971_s6 }
  0xb7   : > { %510 = vrot.lane.b32.xlu2 %v463_v9, %s972_s7  ;;  %776 = vmatpush.msra.mxu2 %v548_v28 }
  0xb8   : > { %777 = vmatpush.msra.mxu3 %v548_v28  ;;  %589 = vmatpush.msra.mxu0 %v548_v28 }
  0xb9   : > { %775 = vmatpush.msra.mxu1 %v548_v28  ;;  %779 = vmatpush.msra.mxu2 %v547_v36 }
  0xba   : > { %780 = vmatpush.msra.mxu3 %v547_v36  ;;  %590 = vmatpush.msra.mxu0 %v547_v36 }
  0xbb   : > { %778 = vmatpush.msra.mxu1 %v547_v36  ;;  %782 = vmatpush.msra.mxu2 %v546_v38 }
  0xbc   : > { %v344_v20 = vpop.permute.xlu1 %343  ;;  %v427_v21 = vpop.permute.xlu0 %426  ;;  %783 = vmatpush.msra.mxu3 %v546_v38  ;;  %591 = vmatpush.msra.mxu0 %v546_v38 }
  0xbd   : > { %v444_v27 = vsel %vm440_vm3, %v1156_v48, %v344_v20  ;;  %v465_v48 = vsel %vm453_vm4, %v452_v46, %v427_v21  ;;  %781 = vmatpush.msra.mxu1 %v546_v38  ;;  %785 = vmatpush.msra.mxu2 %v545_v39  ;;  %v872_v20 = vld [vmem:[%s1454_s2] ss:$0 sm:$0xff] }
  0xbe   : > { %786 = vmatpush.msra.mxu3 %v545_v39  ;;  %592 = vmatpush.msra.mxu0 %v545_v39 }
  0xbf   : > { %512 = vrot.lane.b32.xlu2 %v464_v10, %s972_s7  ;;  %784 = vmatpush.msra.mxu1 %v545_v39 }
  0xc0   : > { %788 = vmatpush.msra.mxu2 %v544_v40  ;;  %789 = vmatpush.msra.mxu3 %v544_v40 }
  0xc1   : > { %593 = vmatpush.msra.mxu0 %v544_v40  ;;  %787 = vmatpush.msra.mxu1 %v544_v40 }
  0xc2   : > { %791 = vmatpush.msra.mxu2 %v543_v41  ;;  %792 = vmatpush.msra.mxu3 %v543_v41 }
  0xc3   : > { %594 = vmatpush.msra.mxu0 %v543_v41  ;;  %790 = vmatpush.msra.mxu1 %v543_v41 }
  0xc4   : > { %v415_v30 = vpop.permute.xlu1 %414  ;;  %v411_v31 = vpop.permute.xlu0 %410  ;;  %794 = vmatpush.msra.mxu2 %v542_v26  ;;  %795 = vmatpush.msra.mxu3 %v542_v26 }
  0xc5   : > { %v1300_v32 = vsel %vm453_vm4, %v446_v14, %v415_v30  ;;  %v1303_v33 = vsel %vm453_vm4, %v444_v27, %v411_v31  ;;  %595 = vmatpush.msra.mxu0 %v542_v26  ;;  %793 = vmatpush.msra.mxu1 %v542_v26 }
  0xc6   : > { %480 = vrot.lane.b32.xlu1 %v1300_v32, %s971_s6  ;;  %476 = vrot.lane.b32.xlu0 %v1303_v33, %s971_s6  ;;  %s762_s6 = sshll.u32 %s955_s16, 5 }
  0xc7   : > { %406 = vrot.lane.b32.xlu2 %v378_v29, %s969_s27 }
  0xcc   : > { %v405_v44 = vpop.permute.xlu1 %404  ;;  %v338_v52 = vpop.permute.xlu0 %337 }
  0xcd   : > { %v441_v60 = vsel %vm440_vm3, %v1229_v43, %v338_v52 }
  0xce   : > { %514 = vrot.lane.b32.xlu0 %v465_v48, %s972_s7  ;;  %v454_v62 = vsel %vm453_vm4, %v441_v60, %v405_v44 }
  0xcf   : > { %502 = vrot.lane.b32.xlu2 %v1300_v32, %s972_s7 }
  0xd4   : > { %v340_v50 = vpop.permute.xlu1 %339 }
  0xd6   : > { %506 = vrot.lane.b32.xlu0 %v1282_v19, %s972_s7  ;;  %s650_s7 = sadd.s32 %s768_s5, %s762_s6  ;;  %s893_s6 = scalar_lea.hbm %s1455_s3, 512 }
  0xd7   : > { %s763_s8 = sshll.u32 %s650_s7, 3 }
  0xd8   : > { %s652_s11 = scalar_lea.hbm %s1455_s3, %s763_s8 }
  0xd9   : > { %s655_s24 = sshll.u32 %s652_s11, 4  ;;  %s656_s24 = int_to_ptr.hbm [resolvable:$true] %s655_s24 }
  0xda   : > { %s887_s16 = sshra.s32 %s656_s24, 4  ;;  %s888_s16 = int_to_ptr.hbm [resolvable:$true] %s887_s16 }
  0xdb   : > { %s889_s27 = scalar_lea.hbm %s888_s16, 64  ;;  %p894_p5 = scmp.lt.s32.totalorder %s888_s16, %s1455_s3 }
  0xdc   : > { %p890_p1 = scmp.ne.s32.totalorder %s888_s16, %s889_s27  ;;  %p895_p6 = scmp.lt.s32.totalorder %s893_s6, %s889_s27 }
  0xde   : > { %p891_p2 = pnand %p890_p1, %p1045_p3  ;;  %p896_p7 = por %p895_p6, %p894_p5 }
  0xe0   : > { %p892_p4 = pneg %p891_p2 }
  0xe2   : > { %p897_p9 = pnand %p896_p7, %p892_p4 }
  0xf1   : > { %v483_v37 = vpop.permute.xlu2 %482 }
  0xf2   : > { %v529_v53 = vsel %vm524_vm5, %v1268_v17, %v483_v37 }
 0x101   : > { %v475_v45 = vpop.permute.xlu2 %474 }
 0x102   : > { %v525_v0 = vsel %vm524_vm5, %v454_v62, %v475_v45 }
 0x109   : > { %v505_v51 = vpop.permute.xlu2 %504 }
 0x111   : > { %v511_v54 = vpop.permute.xlu2 %510  ;;  %v509_v55 = vpop.permute.xlu1 %508 }
 0x112   : > { %v538_v56 = vsel %vm533_vm6, %v529_v53, %v509_v55  ;;  %v487_v57 = vpop.permute.xlu0 %486 }
 0x113   : > { %755 = vmatmul.msk.f32.vlgmr.msra.gmra.mxu2 %vm555_vm7, %v538_v56  ;;  %v531_v58 = vsel %vm524_vm5, %v1249_v63, %v487_v57 }
 0x119   : > { %v513_v59 = vpop.permute.xlu2 %512 }
 0x11a   : > { %v540_v61 = vsel %vm533_vm6, %v531_v58, %v513_v59 }
 0x11b   : > { %757 = vmatmul.msk.f32.vlgmr.msra.gmra.mxu3 %vm555_vm7, %v540_v61 }
 0x120   : > { %v501_v2 = vpop.permute.xlu1 %500  ;;  %v479_v1 = vpop.permute.xlu0 %478 }
 0x121   : > { %v527_v3 = vsel %vm524_vm5, %v1261_v8, %v479_v1  ;;  %v534_v4 = vsel %vm533_vm6, %v525_v0, %v501_v2  ;;  %v407_v7 = vpop.permute.xlu2 %406  ;;  %v442_v8 = vsel %vm440_vm3, %v1226_v42, %v340_v50 }
 0x122   : > { %751 = vmatmul.msk.f32.vlgmr.msra.gmra.mxu0 %vm555_vm7, %v534_v4  ;;  %v536_v63 = vsel %vm533_vm6, %v527_v3, %v505_v51  ;;  %v455_v12 = vsel %vm453_vm4, %v442_v8, %v407_v7 }
 0x123   : > { %753 = vmatmul.msk.f32.vlgmr.msra.gmra.mxu1 %vm555_vm7, %v536_v63 }
 0x128   : > { %v485_v43 = vpop.permute.xlu0 %484  ;;  %v489_v49 = vpop.permute.xlu1 %488 }
 0x129   : > { %v530_v11 = vsel %vm524_vm5, %v1300_v32, %v485_v43  ;;  %v503_v13 = vpop.permute.xlu2 %502  ;;  %v532_v6 = vsel %vm524_vm5, %v1282_v19, %v489_v49 }
 0x12a   : > { %v539_v5 = vsel %vm533_vm6, %v530_v11, %v511_v54 }
 0x12b   : > { %756 = vmatmul.msk.f32.gmra.mxu2 %vm555_vm7, %v539_v5 }
 0x138   : > { %v477_v25 = vpop.permute.xlu0 %476  ;;  %v481_v42 = vpop.permute.xlu1 %480 }
 0x139   : > { %v526_v15 = vsel %vm524_vm5, %v455_v12, %v477_v25  ;;  %v528_v16 = vsel %vm524_vm5, %v1303_v33, %v481_v42 }
 0x13a   : > { %v535_v17 = vsel %vm533_vm6, %v526_v15, %v503_v13 }
 0x13b   : > { %752 = vmatmul.msk.f32.gmra.mxu0 %vm555_vm7, %v535_v17 }
 0x140   : > { %v515_v47 = vpop.permute.xlu0 %514 }
 0x141   : > { %v541_v9 = vsel %vm533_vm6, %v532_v6, %v515_v47 }
 0x142   : > { %758 = vmatmul.msk.f32.gmra.mxu3 %vm555_vm7, %v541_v9 }
 0x148   : > { %v507_v18 = vpop.permute.xlu0 %506 }
 0x149   : > { %v537_v22 = vsel %vm533_vm6, %v528_v16, %v507_v18 }
 0x14a   : > { %754 = vmatmul.msk.f32.gmra.mxu1 %vm555_vm7, %v537_v22 }
 0x196   : > { %v609_v19 = vpop.f32.mrf.mxu2 }
 0x197   : > { %v610_v21 = vadd.f32 %v872_v20, %v609_v19 }
 0x199   : > { %v625_v10 = vmax.f32 %v610_v21, 0.0 }
 0x19b   : > { %633 = vst.msk [vmem:[%s1387_s4 + $0x20] sm:$0xff] %vm453_vm4, %v625_v10 }
 0x19e   : > { %v615_v23 = vpop.f32.mrf.mxu3 }
 0x19f   : > { %v616_v24 = vadd.f32 %v872_v20, %v615_v23  ;;  %v597_v27 = vpop.f32.mrf.mxu0 }
 0x1a0   : > { %v598_v14 = vadd.f32 %v872_v20, %v597_v27  ;;  %v603_v30 = vpop.f32.mrf.mxu1 }
 0x1a1   : > { %v627_v31 = vmax.f32 %v616_v24, 0.0  ;;  %v604_v29 = vadd.f32 %v872_v20, %v603_v30 }
 0x1a2   : > { %v621_v32 = vmax.f32 %v598_v14, 0.0 }
 0x1a3   : > { %635 = vst.msk [vmem:[%s1387_s4 + $0x30] sm:$0xff] %vm453_vm4, %v627_v31  ;;  %v623_v33 = vmax.f32 %v604_v29, 0.0 }
 0x1a4   : > { %629 = vst.msk [vmem:[%s1387_s4] sm:$0xff] %vm453_vm4, %v621_v32 }
 0x1a5   : > { %631 = vst.msk [vmem:[%s1387_s4 + $0x10] sm:$0xff] %vm453_vm4, %v623_v33 }
 0x1ae   : > { %v612_v46 = vpop.f32.mrf.mxu2 }
 0x1af   : > { %v613_v48 = vadd.f32 %v872_v20, %v612_v46 }
 0x1b1   : > { %v626_v34 = vmax.f32 %v613_v48, 0.0 }
 0x1b3   : > { %634 = vst.msk [vmem:[%s1387_s4 + $0x28] sm:$0xff] %vm453_vm4, %v626_v34 }
 0x1b8   : > { %v600_v35 = vpop.f32.mrf.mxu0 }
 0x1b9   : > { %v601_v28 = vadd.f32 %v872_v20, %v600_v35 }
 0x1bb   : > { %v622_v36 = vmax.f32 %v601_v28, 0.0 }
 0x1bd   : > { %630 = vst.msk [vmem:[%s1387_s4 + $0x8] sm:$0xff] %vm453_vm4, %v622_v36 }
 0x1c5   : > { %v618_v38 = vpop.f32.mrf.mxu3 }
 0x1c6   : > { %v619_v39 = vadd.f32 %v872_v20, %v618_v38 }
 0x1c7   : > { %v606_v40 = vpop.f32.mrf.mxu1 }
 0x1c8   : > { %v628_v41 = vmax.f32 %v619_v39, 0.0  ;;  %v607_v26 = vadd.f32 %v872_v20, %v606_v40 }
 0x1ca   : > { %636 = vst.msk [vmem:[%s1387_s4 + $0x38] sm:$0xff] %vm453_vm4, %v628_v41  ;;  %v624_v37 = vmax.f32 %v607_v26, 0.0 }
 0x1cc   : > { %632 = vst.msk [vmem:[%s1387_s4 + $0x18] sm:$0xff] %vm453_vm4, %v624_v37 }
 0x1cd   : > { %900 = shalt.err (!%p897_p9)
}
 0x1ce   : > { %s973_s21 = smov 128  }
 0x1cf   : > { %796 = dma.vmem_to_hbm [thread:$0]  (%p1045_p3), %s654_s20, 1024, %s656_s24, %s638_s15, %s973_s21, %s973_s21, %s970_s28  }
 0x1d0 PF: > { %p802_p10 = scmp.ge.s32.totalorder %s967_s19, 2  ;;  %s670_s4 = sand.u32 1, %s939_s12  }
 0x1d1   : > { %s671_s9 = scalar_lea.sflag [#allocation3], %s670_s4 }
 0x1d2   : > { %p799_p11 = pnand %p802_p10, %p1054_p8 }
 0x1d4   : > { %p800_p12 = pneg %p799_p11 }
 0x1d6   : > { %934 = dma.done.wait (%p800_p12), %s671_s9, 1024  }
 0x1d7   : > { %936 = vsyncadd (%p800_p12), %s671_s9, 4294966272  ;;  %s16_s19 = sadd.s32 1, %s967_s19   ;;  %s1458_s12 = smov %s943_s13 }
 0x1d8   : > { %p13_p13 = scmp.ge.s32.totalorder %s16_s19, 10   ;;  %s1459_s13 = smov %s947_s14 }
 0x1d9   : > { %s1460_s14 = smov %s1063_s30  ;;  %s1461_s15 = smov %s959_s17 }
 0x1da   : > { %s1462_s16 = smov %s963_s18  ;;  %s1463_s17 = smov %s1466_s22 }
 0x1db   : > { %s1464_s18 = smov %s1470_s23  ;;  %15 = sbr.rel (!%p13_p13) target bundleno = 5 (0x5), region = 70 }
 0x1e0   :  { %677 = vsyncpa [#allocation3], 1 }
 0x1e1   :  { %679 = vsyncpa [#allocation3 + $0x1], 1 }

</bundles_post_ra>
